<compile_context>
chip_gen: v7x
topology: tpu7x:2x2x1
jax: 0.10.0
libtpu: 0.0.40
codegen_flags: <defaults>
</compile_context>

<pallas_src>
import functools

import jax
import jax.numpy as jnp
from jax import lax
from jax.experimental import pallas as pl
from jax.experimental.pallas import tpu as pltpu


def _round_up(x, m):
    return ((x + m - 1) // m) * m


# ----------------------------------------------------------------------------
# Pallas kernel: one grid step == one batch tile of TB elements (TB*N key rows).
# ----------------------------------------------------------------------------
def _attn_kernel(n_head, d_k, d_v, eps,
                 src_ref, srct_ref, seq_ref, seqe_ref, seqt_ref, mask_ref,
                 wq_d_ref, wq_t_ref,
                 wkv_d_ref, wkv_e_ref, wkv_t_ref,
                 sel_qk_ref, sel_v_ref,
                 wfc_ref, bfc_ref, gamma_ref, beta_ref,
                 out_ref, attn_ref):
    f32 = jnp.float32
    tb, n = mask_ref.shape
    hk = n_head * d_k
    hv = n_head * d_v
    inv_temp = 1.0 / (float(d_k) ** 0.5)

    # --- Projections on the MXU; K and V fused into one wide matmul per group.
    qp = (jnp.dot(src_ref[...], wq_d_ref[...], preferred_element_type=f32)
          + jnp.dot(srct_ref[...], wq_t_ref[...], preferred_element_type=f32))      # [TB, HK]
    kvp = (jnp.dot(seq_ref[...], wkv_d_ref[...], preferred_element_type=f32)
           + jnp.dot(seqe_ref[...], wkv_e_ref[...], preferred_element_type=f32)
           + jnp.dot(seqt_ref[...], wkv_t_ref[...], preferred_element_type=f32))    # [TB*N, HK+HV]
    kp = kvp[:, :hk]                                                                 # [TB*N, HK]
    vp = kvp[:, hk:]                                                                 # [TB*N, HV]

    # --- Scores for ALL heads at once (no per-head lane slices):
    # elementwise q*k over the full lane width, then a per-head reduce as one
    # MXU matmul against a [HK, H] block-diagonal ones matrix.
    q_bc = jnp.broadcast_to(qp[:, None, :], (tb, n, hk)).reshape(tb * n, hk)
    prod = q_bc * kp                                                                 # VPU
    scores = jnp.dot(prod, sel_qk_ref[...], preferred_element_type=f32) * inv_temp  # [TB*N, H]
    scores = scores.reshape(tb, n, n_head)

    # --- Masked softmax over the key axis (all heads together), in f32.
    # masked_fill(mask, -1e10) is identical whether the mask has any True or not.
    mask3 = mask_ref[...][:, :, None]            # [TB, N, 1]; 1.0 == null key
    scores = jnp.where(mask3 > 0, jnp.float32(-1e10), scores)
    m = jnp.max(scores, axis=1, keepdims=True)
    p = jnp.exp(scores - m)
    s = jnp.sum(p, axis=1, keepdims=True)
    attn = p / s                                  # exact divide (correctness fix)

    # Lane-dense single-slab attention store: [TB, N*H] (layout n*H + h);
    # the wrapper restores torch's head-major [H*B, N] layout.
    attn_ref[...] = attn.reshape(tb, n * n_head)

    # --- attn @ V for all heads: expand attn over the d_v lanes on the MXU
    # ([TB*N, H] @ [H, HV] block-expansion ones), multiply, segment-reduce over N.
    attn_flat = attn.reshape(tb * n, n_head)
    attn_bc = jnp.dot(attn_flat, sel_v_ref[...], preferred_element_type=f32)        # [TB*N, HV]
    out_hv = jnp.sum((attn_bc * vp).reshape(tb, n, hv), axis=1)                      # [TB, HV]

    # --- Single FC matmul (head concat folded in), bias, LayerNorm (f32).
    y = jnp.dot(out_hv.astype(wfc_ref.dtype), wfc_ref[...],
                preferred_element_type=f32) + bfc_ref[...]                            # [TB, M]
    mean = jnp.mean(y, axis=-1, keepdims=True)
    var = jnp.mean((y - mean) ** 2, axis=-1, keepdims=True)
    y = (y - mean) * lax.rsqrt(var + eps)
    out_ref[...] = y * gamma_ref[...] + beta_ref[...]


# ----------------------------------------------------------------------------
# Wrapper: plain-JAX glue (padding / weight fusion / layout) + pallas_call.
# ----------------------------------------------------------------------------
def attn_model_forward(params, src, src_t, seq, seq_t, seq_e, time_diff, mask,
                       compute_dtype=jnp.float32, max_tb=512):
    del time_diff  # accepted for API parity; the reference code path is dead.
    B, N, D = seq.shape
    De = seq_e.shape[-1]
    Dt = seq_t.shape[-1]
    M = D + De + Dt
    H = int(params["n_head"])
    assert M % H == 0
    d_k = M // H
    d_v = M // H
    HK, HV = H * d_k, H * d_v

    if src_t.ndim == 3:
        assert src_t.shape == (B, 1, Dt), f"unexpected src_t shape {src_t.shape}"
        src_t2 = src_t.reshape(B, Dt)
    else:
        assert src_t.shape == (B, Dt), f"unexpected src_t shape {src_t.shape}"
        src_t2 = src_t

    # ---------------- VMEM-aware batch-tile selection ----------------
    in_bytes = jnp.dtype(compute_dtype).itemsize
    # Per-tile-row bytes: pipelined I/O tiles (double-buffered) ...
    io_row = in_bytes * (D + Dt + N * (D + De + Dt)) + 4 * (N + M + N * H)
    # ... plus the in-kernel f32 intermediates (these dominate at realistic N*M).
    interm_row = 4 * (HK                       # qp
                      + N * (HK + HV)          # kvp
                      + N * (HK + HV)          # kp / vp slices
                      + 2 * N * HK             # q_bc, prod
                      + 3 * N * H              # scores / p / attn
                      + 2 * N * HV             # attn_bc, weighted
                      + HV + 2 * M)            # out_hv, y, out
    weight_bytes = (in_bytes * ((D + Dt) * HK + (D + De + Dt) * (HK + HV) + HV * M)
                    + 4 * (HK * H + H * HV + 3 * M))
    vmem_budget = 24 * 1024 * 1024             # conservative: fits v7x's 32 MiB scoped default
    avail = max(1, vmem_budget - 2 * weight_bytes)   # weights stay resident (2 pipeline bufs)
    per_row = 2 * io_row + interm_row
    tb_cap = max(8, avail // max(1, per_row))
    tb_cap = min(tb_cap, max_tb)

    if B <= 8:
        TB = B                                  # tiny batch: one step
    else:
        # >= 2 grid steps so ("parallel",) can shard across both v7x TensorCores.
        half = _round_up(pl.cdiv(B, 2), 8)
        TB = max(8, (min(tb_cap, half) // 8) * 8)
    Bp = _round_up(B, TB)

    def pad_b(x):
        if Bp == B:
            return x
        return jnp.pad(x, [(0, Bp - B)] + [(0, 0)] * (x.ndim - 1))

    cd = compute_dtype
    srcf = pad_b(src).astype(cd)                           # [Bp, D]
    srctf = pad_b(src_t2).astype(cd)                       # [Bp, Dt]
    seqf = pad_b(seq).reshape(Bp * N, D).astype(cd)        # [Bp*N, D]
    seqef = pad_b(seq_e).reshape(Bp * N, De).astype(cd)    # [Bp*N, De]
    seqtf = pad_b(seq_t).reshape(Bp * N, Dt).astype(cd)    # [Bp*N, Dt]
    maskf = pad_b(mask.astype(jnp.float32))                # [Bp, N] (padding = unmasked)

    # Split projection weights by feature group (folds the q/k concats into the
    # matmuls; q's edge block multiplies zeros so its slice is dropped), and
    # fuse K|V along the output dim so the kernel runs one wide matmul per group.
    wqT = params["wq"].T.astype(cd)                                      # [M, HK]
    wkvT = jnp.concatenate([params["wk"].T, params["wv"].T], axis=1).astype(cd)  # [M, HK+HV]
    wq_d, wq_t = wqT[:D], wqT[D + De:]
    wkv_d, wkv_e, wkv_t = wkvT[:D], wkvT[D:D + De], wkvT[D + De:]
    wfc2 = params["wfc"].T.astype(cd)                                    # [HV, M]
    bfc = params["bfc"].reshape(1, M).astype(jnp.float32)
    gamma = params["gamma"].reshape(1, M).astype(jnp.float32)
    beta = params["beta"].reshape(1, M).astype(jnp.float32)

    # Block-diagonal head-selection / head-expansion matrices (used on the MXU).
    heads = jnp.arange(H)
    sel_qk = (jnp.repeat(heads, d_k)[:, None] == heads[None, :]).astype(jnp.float32)  # [HK, H]
    sel_v = (heads[:, None] == jnp.repeat(heads, d_v)[None, :]).astype(jnp.float32)   # [H, HV]

    kernel = functools.partial(_attn_kernel, H, d_k, d_v, 1e-5)

    def tile2(rows, cols):
        return pl.BlockSpec((rows, cols), lambda i: (i, 0))

    def whole(shape):
        return pl.BlockSpec(shape, lambda i: tuple(0 for _ in shape))

    flops = 2 * Bp * (N * (D + De + Dt) * (HK + HV)   # fused K/V projection
                      + (D + Dt) * HK                 # Q projection
                      + N * HK                        # q*k elementwise
                      + N * HK * H                    # per-head score reduce (MXU)
                      + N * H * HV                    # attn expansion (MXU)
                      + N * HV                        # attn * V + reduce
                      + HV * M)                       # FC
    inputs = (srcf, srctf, seqf, seqef, seqtf, maskf,
              wq_d, wq_t, wkv_d, wkv_e, wkv_t, sel_qk, sel_v,
              wfc2, bfc, gamma, beta)
    bytes_accessed = int(sum(int(x.size) * x.dtype.itemsize for x in inputs)
                         + Bp * M * 4 + Bp * N * H * 4)
    cost = pl.CostEstimate(flops=int(flops),
                           transcendentals=int(Bp * N * H),
                           bytes_accessed=bytes_accessed)

    est_bytes = 2 * weight_bytes + TB * per_row + (1 << 20)
    vmem_limit = int(min(64 * 2**20, max(16 * 2**20, 2 * est_bytes)))

    out_p, attn_p = pl.pallas_call(
        kernel,
        out_shape=(jax.ShapeDtypeStruct((Bp, M), jnp.float32),
                   jax.ShapeDtypeStruct((Bp, N * H), jnp.float32)),
        grid=(Bp // TB,),
        in_specs=[
            tile2(TB, D),                    # src
            tile2(TB, Dt),                   # src_t
            tile2(TB * N, D),                # seq   (flattened)
            tile2(TB * N, De),               # seq_e (flattened)
            tile2(TB * N, Dt),               # seq_t (flattened)
            tile2(TB, N),                    # mask
            whole((D, HK)), whole((Dt, HK)),                       # Wq  (feat, time)
            whole((D, HK + HV)), whole((De, HK + HV)), whole((Dt, HK + HV)),  # W[k|v]
            whole((HK, H)), whole((H, HV)),                        # head select / expand
            whole((HV, M)), whole((1, M)), whole((1, M)), whole((1, M)),      # FC, bias, LN
        ],
        out_specs=(
            pl.BlockSpec((TB, M), lambda i: (i, 0)),       # output    [Bp, M]
            pl.BlockSpec((TB, N * H), lambda i: (i, 0)),   # attention [Bp, N*H]
        ),
        compiler_params=pltpu.CompilerParams(
            dimension_semantics=("parallel",),             # megacore on v7x
            vmem_limit_bytes=vmem_limit),
        cost_estimate=cost,
    )(*inputs)

    # Match PyTorch: output.squeeze() -> [B, M]; attn.squeeze() -> [H*B, N] head-major.
    output = out_p[:B]
    attn = jnp.transpose(attn_p[:B].reshape(B, N, H), (2, 0, 1)).reshape(H * B, N)
    return output, attn


# ----------------------------------------------------------------------------
# Deterministic parameter init (shapes from MultiHeadAttention.__init__).
# ----------------------------------------------------------------------------
def init_params(key, model_dim, n_head):
    d_k = model_dim // n_head
    d_v = model_dim // n_head
    ks = jax.random.split(key, 5)
    std_qk = (2.0 / (model_dim + d_k)) ** 0.5
    std_v = (2.0 / (model_dim + d_v)) ** 0.5
    std_fc = (2.0 / (n_head * d_v + model_dim)) ** 0.5   # xavier_normal
    return {
        "n_head": n_head,
        "wq": std_qk * jax.random.normal(ks[0], (n_head * d_k, model_dim), jnp.float32),
        "wk": std_qk * jax.random.normal(ks[1], (n_head * d_k, model_dim), jnp.float32),
        "wv": std_v * jax.random.normal(ks[2], (n_head * d_v, model_dim), jnp.float32),
        "wfc": std_fc * jax.random.normal(ks[3], (model_dim, n_head * d_v), jnp.float32),
        "bfc": 0.01 * jax.random.normal(ks[4], (model_dim,), jnp.float32),
        "gamma": jnp.ones((model_dim,), jnp.float32),
        "beta": jnp.zeros((model_dim,), jnp.float32),
    }


# ----------------------------------------------------------------------------
# Pure-JAX reference (mirrors the PyTorch forward, eval-mode) for validation.
# ----------------------------------------------------------------------------
def reference_forward(params, src, src_t, seq, seq_t, seq_e, mask):
    B, N, _ = seq.shape
    edge_dim = seq_e.shape[-1]
    q = jnp.concatenate(
        [src[:, None, :], jnp.zeros((B, 1, edge_dim), src.dtype), src_t], axis=2)
    k = jnp.concatenate([seq, seq_e, seq_t], axis=2)
    M = q.shape[-1]
    H = params["n_head"]
    dk = M // H
    dv = M // H
    qp = (q.reshape(B, M) @ params["wq"].T).reshape(B, 1, H, dk)
    kp = (k.reshape(B * N, M) @ params["wk"].T).reshape(B, N, H, dk)
    vp = (k.reshape(B * N, M) @ params["wv"].T).reshape(B, N, H, dv)
    qh = jnp.transpose(qp, (2, 0, 1, 3)).reshape(H * B, 1, dk)
    kh = jnp.transpose(kp, (2, 0, 1, 3)).reshape(H * B, N, dk)
    vh = jnp.transpose(vp, (2, 0, 1, 3)).reshape(H * B, N, dv)
    scores = jnp.einsum("bqd,bkd->bqk", qh, kh) / (float(dk) ** 0.5)
    mask_rep = jnp.tile(mask[:, None, :], (H, 1, 1))
    scores = jnp.where(mask_rep, -1e10, scores)
    attn = jax.nn.softmax(scores, axis=2)
    out = jnp.einsum("bqk,bkd->bqd", attn, vh)
    out = out.reshape(H, B, 1, dv).transpose(1, 2, 0, 3).reshape(B, 1, H * dv)
    out = out @ params["wfc"].T + params["bfc"]
    mean = out.mean(-1, keepdims=True)
    var = ((out - mean) ** 2).mean(-1, keepdims=True)
    out = (out - mean) / jnp.sqrt(var + 1e-5) * params["gamma"] + params["beta"]
    return out[:, 0, :], attn[:, 0, :]


if __name__ == "__main__":
    B, N = 2, 8
    feat_dim, edge_dim, time_dim, n_head = 16, 8, 8, 2
    model_dim = feat_dim + edge_dim + time_dim   # 32, divisible by n_head

    key = jax.random.PRNGKey(0)
    (k_src, k_srct, k_seq, k_seqt, k_seqe,
     k_mask, k_td, k_par) = jax.random.split(key, 8)

    src = jax.random.normal(k_src, (B, feat_dim), jnp.float32)
    src_t = jax.random.normal(k_srct, (B, 1, time_dim), jnp.float32)
    seq = jax.random.normal(k_seq, (B, N, feat_dim), jnp.float32)
    seq_t = jax.random.normal(k_seqt, (B, N, time_dim), jnp.float32)
    seq_e = jax.random.normal(k_seqe, (B, N, edge_dim), jnp.float32)
    mask = jax.random.bernoulli(k_mask, 0.3, (B, N))
    mask = mask.at[:, 0].set(False)              # keep at least one valid key
    time_diff = jax.random.uniform(k_td, (B, N), jnp.float32)

    params = init_params(k_par, model_dim, n_head)

    # --- f32 run (tight parity with the reference) ---
    out, attn = attn_model_forward(params, src, src_t, seq, seq_t, seq_e,
                                   time_diff, mask)
    jax.block_until_ready((out, attn))

    ref_out, ref_attn = reference_forward(params, src, src_t, seq, seq_t,
                                          seq_e, mask)
    assert out.shape == (B, model_dim) and attn.shape == (n_head * B, N)
    assert jnp.allclose(out, ref_out, atol=2e-3, rtol=2e-3)
    assert jnp.allclose(attn, ref_attn, atol=2e-3, rtol=2e-3)

    # --- multi-tile (grid > 1) + batch-padding path ---
    B2 = 20
    k2 = jax.random.PRNGKey(1)
    (j_src, j_srct, j_seq, j_seqt, j_seqe, j_mask) = jax.random.split(k2, 6)
    src2 = jax.random.normal(j_src, (B2, feat_dim), jnp.float32)
    src_t2 = jax.random.normal(j_srct, (B2, 1, time_dim), jnp.float32)
    seq2 = jax.random.normal(j_seq, (B2, N, feat_dim), jnp.float32)
    seq_t2 = jax.random.normal(j_seqt, (B2, N, time_dim), jnp.float32)
    seq_e2 = jax.random.normal(j_seqe, (B2, N, edge_dim), jnp.float32)
    mask2 = jax.random.bernoulli(j_mask, 0.3, (B2, N))
    mask2 = mask2.at[:, 0].set(False)

    out2, attn2 = attn_model_forward(params, src2, src_t2, seq2, seq_t2, seq_e2,
                                     None, mask2, max_tb=8)
    jax.block_until_ready((out2, attn2))
    ref_out2, ref_attn2 = reference_forward(params, src2, src_t2, seq2,
                                            seq_t2, seq_e2, mask2)
    assert out2.shape == (B2, model_dim) and attn2.shape == (n_head * B2, N)
    assert jnp.allclose(out2, ref_out2, atol=2e-3, rtol=2e-3)
    assert jnp.allclose(attn2, ref_attn2, atol=2e-3, rtol=2e-3)

    # --- bf16-MXU-operand path (smoke test; softmax/LN stay f32) ---
    out_bf, attn_bf = attn_model_forward(params, src, src_t, seq, seq_t, seq_e,
                                         time_diff, mask,
                                         compute_dtype=jnp.bfloat16)
    jax.block_until_ready((out_bf, attn_bf))
    assert bool(jnp.all(jnp.isfinite(out_bf)))
    assert jnp.allclose(out_bf, ref_out, atol=0.25, rtol=0.25)

    print("KERNEL_OK")
</pallas_src>

<mosaic_0001>
module attributes {stable_mosaic.version = 11 : i64} {
  func.func @_attn_kernel(%arg0: i32, %arg1: memref<2x16xf32, #tpu.memory_space<vmem>>, %arg2: memref<2x8xf32, #tpu.memory_space<vmem>>, %arg3: memref<16x16xf32, #tpu.memory_space<vmem>>, %arg4: memref<16x8xf32, #tpu.memory_space<vmem>>, %arg5: memref<16x8xf32, #tpu.memory_space<vmem>>, %arg6: memref<2x8xf32, #tpu.memory_space<vmem>>, %arg7: memref<16x32xf32, #tpu.memory_space<vmem>>, %arg8: memref<8x32xf32, #tpu.memory_space<vmem>>, %arg9: memref<16x64xf32, #tpu.memory_space<vmem>>, %arg10: memref<8x64xf32, #tpu.memory_space<vmem>>, %arg11: memref<8x64xf32, #tpu.memory_space<vmem>>, %arg12: memref<32x2xf32, #tpu.memory_space<vmem>>, %arg13: memref<2x32xf32, #tpu.memory_space<vmem>>, %arg14: memref<32x32xf32, #tpu.memory_space<vmem>>, %arg15: memref<1x32xf32, #tpu.memory_space<vmem>>, %arg16: memref<1x32xf32, #tpu.memory_space<vmem>>, %arg17: memref<1x32xf32, #tpu.memory_space<vmem>>, %arg18: memref<2x32xf32, #tpu.memory_space<vmem>>, %arg19: memref<2x16xf32, #tpu.memory_space<vmem>>) attributes {dimension_semantics = [#tpu.dimension_semantics<parallel>], iteration_bounds = array<i64: 1>, scalar_prefetch = 0 : i64, scratch_operands = 0 : i64, tpu.core_type = #tpu.core_type<tc>, window_params = [{transform_indices = @transform_0, window_bounds = array<i64: 2, 16>}, {transform_indices = @transform_1, window_bounds = array<i64: 2, 8>}, {transform_indices = @transform_2, window_bounds = array<i64: 16, 16>}, {transform_indices = @transform_3, window_bounds = array<i64: 16, 8>}, {transform_indices = @transform_4, window_bounds = array<i64: 16, 8>}, {transform_indices = @transform_5, window_bounds = array<i64: 2, 8>}, {pipeline_mode = #tpu.pipeline_mode<synchronous>, transform_indices = @transform_6, window_bounds = array<i64: 16, 32>}, {pipeline_mode = #tpu.pipeline_mode<synchronous>, transform_indices = @transform_7, window_bounds = array<i64: 8, 32>}, {pipeline_mode = #tpu.pipeline_mode<synchronous>, transform_indices = @transform_8, window_bounds = array<i64: 16, 64>}, {pipeline_mode = #tpu.pipeline_mode<synchronous>, transform_indices = @transform_9, window_bounds = array<i64: 8, 64>}, {pipeline_mode = #tpu.pipeline_mode<synchronous>, transform_indices = @transform_10, window_bounds = array<i64: 8, 64>}, {pipeline_mode = #tpu.pipeline_mode<synchronous>, transform_indices = @transform_11, window_bounds = array<i64: 32, 2>}, {pipeline_mode = #tpu.pipeline_mode<synchronous>, transform_indices = @transform_12, window_bounds = array<i64: 2, 32>}, {pipeline_mode = #tpu.pipeline_mode<synchronous>, transform_indices = @transform_13, window_bounds = array<i64: 32, 32>}, {pipeline_mode = #tpu.pipeline_mode<synchronous>, transform_indices = @transform_14, window_bounds = array<i64: 1, 32>}, {pipeline_mode = #tpu.pipeline_mode<synchronous>, transform_indices = @transform_15, window_bounds = array<i64: 1, 32>}, {pipeline_mode = #tpu.pipeline_mode<synchronous>, transform_indices = @transform_16, window_bounds = array<i64: 1, 32>}, {transform_indices = @transform_17, window_bounds = array<i64: 2, 32>}, {transform_indices = @transform_18, window_bounds = array<i64: 2, 16>}]} {
    %c0 = arith.constant 0 : index
    %c0_0 = arith.constant 0 : index
    %0 = vector.load %arg1[%c0, %c0_0] : memref<2x16xf32, #tpu.memory_space<vmem>>, vector<2x16xf32>
    %c0_1 = arith.constant 0 : index
    %c0_2 = arith.constant 0 : index
    %1 = vector.load %arg7[%c0_1, %c0_2] : memref<16x32xf32, #tpu.memory_space<vmem>>, vector<16x32xf32>
    %cst = arith.constant dense<0.000000e+00> : vector<2x32xf32>
    %2 = tpu.matmul %0, %1, %cst {dimension_numbers = #tpu.dot_dimension_numbers<[1], [0], [0], [1], [0, 0, 1, 1], [], []>} : vector<2x16xf32>, vector<16x32xf32>, vector<2x32xf32> -> vector<2x32xf32>
    %c0_3 = arith.constant 0 : index
    %c0_4 = arith.constant 0 : index
    %3 = vector.load %arg2[%c0_3, %c0_4] : memref<2x8xf32, #tpu.memory_space<vmem>>, vector<2x8xf32>
    %c0_5 = arith.constant 0 : index
    %c0_6 = arith.constant 0 : index
    %4 = vector.load %arg8[%c0_5, %c0_6] : memref<8x32xf32, #tpu.memory_space<vmem>>, vector<8x32xf32>
    %cst_7 = arith.constant dense<0.000000e+00> : vector<2x32xf32>
    %5 = tpu.matmul %3, %4, %cst_7 {dimension_numbers = #tpu.dot_dimension_numbers<[1], [0], [0], [1], [0, 0, 1, 1], [], []>} : vector<2x8xf32>, vector<8x32xf32>, vector<2x32xf32> -> vector<2x32xf32>
    %6 = arith.addf %2, %5 : vector<2x32xf32>
    %c0_8 = arith.constant 0 : index
    %c0_9 = arith.constant 0 : index
    %7 = vector.load %arg3[%c0_8, %c0_9] : memref<16x16xf32, #tpu.memory_space<vmem>>, vector<16x16xf32>
    %c0_10 = arith.constant 0 : index
    %c0_11 = arith.constant 0 : index
    %8 = vector.load %arg9[%c0_10, %c0_11] : memref<16x64xf32, #tpu.memory_space<vmem>>, vector<16x64xf32>
    %cst_12 = arith.constant dense<0.000000e+00> : vector<16x64xf32>
    %9 = tpu.matmul %7, %8, %cst_12 {dimension_numbers = #tpu.dot_dimension_numbers<[1], [0], [0], [1], [0, 0, 1, 1], [], []>} : vector<16x16xf32>, vector<16x64xf32>, vector<16x64xf32> -> vector<16x64xf32>
    %c0_13 = arith.constant 0 : index
    %c0_14 = arith.constant 0 : index
    %10 = vector.load %arg4[%c0_13, %c0_14] : memref<16x8xf32, #tpu.memory_space<vmem>>, vector<16x8xf32>
    %c0_15 = arith.constant 0 : index
    %c0_16 = arith.constant 0 : index
    %11 = vector.load %arg10[%c0_15, %c0_16] : memref<8x64xf32, #tpu.memory_space<vmem>>, vector<8x64xf32>
    %cst_17 = arith.constant dense<0.000000e+00> : vector<16x64xf32>
    %12 = tpu.matmul %10, %11, %cst_17 {dimension_numbers = #tpu.dot_dimension_numbers<[1], [0], [0], [1], [0, 0, 1, 1], [], []>} : vector<16x8xf32>, vector<8x64xf32>, vector<16x64xf32> -> vector<16x64xf32>
    %13 = arith.addf %9, %12 : vector<16x64xf32>
    %c0_18 = arith.constant 0 : index
    %c0_19 = arith.constant 0 : index
    %14 = vector.load %arg5[%c0_18, %c0_19] : memref<16x8xf32, #tpu.memory_space<vmem>>, vector<16x8xf32>
    %c0_20 = arith.constant 0 : index
    %c0_21 = arith.constant 0 : index
    %15 = vector.load %arg11[%c0_20, %c0_21] : memref<8x64xf32, #tpu.memory_space<vmem>>, vector<8x64xf32>
    %cst_22 = arith.constant dense<0.000000e+00> : vector<16x64xf32>
    %16 = tpu.matmul %14, %15, %cst_22 {dimension_numbers = #tpu.dot_dimension_numbers<[1], [0], [0], [1], [0, 0, 1, 1], [], []>} : vector<16x8xf32>, vector<8x64xf32>, vector<16x64xf32> -> vector<16x64xf32>
    %17 = arith.addf %13, %16 : vector<16x64xf32>
    %18 = vector.extract_strided_slice %17 {offsets = [0, 0], sizes = [16, 32], strides = [1, 1]} : vector<16x64xf32> to vector<16x32xf32>
    %19 = vector.extract_strided_slice %17 {offsets = [0, 32], sizes = [16, 32], strides = [1, 1]} : vector<16x64xf32> to vector<16x32xf32>
    %20 = vector.shape_cast %6 : vector<2x32xf32> to vector<2x1x32xf32>
    %21 = vector.shape_cast %20 : vector<2x1x32xf32> to vector<2x1x32xf32>
    %22 = vector.broadcast %21 : vector<2x1x32xf32> to vector<2x8x32xf32>
    %23 = vector.shape_cast %22 : vector<2x8x32xf32> to vector<16x32xf32>
    %24 = arith.mulf %23, %18 : vector<16x32xf32>
    %c0_23 = arith.constant 0 : index
    %c0_24 = arith.constant 0 : index
    %25 = vector.load %arg12[%c0_23, %c0_24] : memref<32x2xf32, #tpu.memory_space<vmem>>, vector<32x2xf32>
    %cst_25 = arith.constant dense<0.000000e+00> : vector<16x2xf32>
    %26 = tpu.matmul %24, %25, %cst_25 {dimension_numbers = #tpu.dot_dimension_numbers<[1], [0], [0], [1], [0, 0, 1, 1], [], []>} : vector<16x32xf32>, vector<32x2xf32>, vector<16x2xf32> -> vector<16x2xf32>
    %cst_26 = arith.constant 2.500000e-01 : f32
    %27 = vector.broadcast %cst_26 : f32 to vector<16x2xf32>
    %28 = arith.mulf %26, %27 : vector<16x2xf32>
    %29 = vector.shape_cast %28 : vector<16x2xf32> to vector<2x8x2xf32>
    %c0_27 = arith.constant 0 : index
    %c0_28 = arith.constant 0 : index
    %30 = vector.load %arg6[%c0_27, %c0_28] : memref<2x8xf32, #tpu.memory_space<vmem>>, vector<2x8xf32>
    %31 = vector.shape_cast %30 : vector<2x8xf32> to vector<2x8x1xf32>
    %cst_29 = arith.constant 0.000000e+00 : f32
    %32 = vector.broadcast %cst_29 : f32 to vector<2x8x1xf32>
    %33 = arith.cmpf ogt, %31, %32 : vector<2x8x1xf32>
    %cst_30 = arith.constant -1.000000e+10 : f32
    %34 = vector.shape_cast %33 : vector<2x8x1xi1> to vector<2x8x1xi1>
    %35 = vector.broadcast %34 : vector<2x8x1xi1> to vector<2x8x2xi1>
    %36 = vector.broadcast %cst_30 : f32 to vector<2x8x2xf32>
    %37 = arith.select %35, %36, %29 : vector<2x8x2xi1>, vector<2x8x2xf32>
    %cst_31 = arith.constant dense<0xFF800000> : vector<2x2xf32>
    %38 = vector.multi_reduction <maximumf>, %37, %cst_31 [1] : vector<2x8x2xf32> to vector<2x2xf32>
    %39 = vector.shape_cast %38 : vector<2x2xf32> to vector<2x1x2xf32>
    %40 = vector.broadcast %39 : vector<2x1x2xf32> to vector<2x8x2xf32>
    %41 = arith.subf %37, %40 : vector<2x8x2xf32>
    %42 = math.exp %41 : vector<2x8x2xf32>
    %cst_32 = arith.constant dense<0.000000e+00> : vector<2x2xf32>
    %43 = vector.multi_reduction <add>, %42, %cst_32 [1] : vector<2x8x2xf32> to vector<2x2xf32>
    %44 = vector.shape_cast %43 : vector<2x2xf32> to vector<2x1x2xf32>
    %45 = vector.broadcast %44 : vector<2x1x2xf32> to vector<2x8x2xf32>
    %46 = arith.divf %42, %45 : vector<2x8x2xf32>
    %47 = vector.shape_cast %46 : vector<2x8x2xf32> to vector<2x16xf32>
    %c0_33 = arith.constant 0 : index
    %c0_34 = arith.constant 0 : index
    %48 = vector.load %arg19[%c0_33, %c0_34] : memref<2x16xf32, #tpu.memory_space<vmem>>, vector<2x16xf32>
    tpu.vector_store %arg19[%c0_33, %c0_34], %47 {strides = array<i32>} : memref<2x16xf32, #tpu.memory_space<vmem>>, vector<2x16xf32>,
    %49 = vector.shape_cast %46 : vector<2x8x2xf32> to vector<16x2xf32>
    %c0_35 = arith.constant 0 : index
    %c0_36 = arith.constant 0 : index
    %50 = vector.load %arg13[%c0_35, %c0_36] : memref<2x32xf32, #tpu.memory_space<vmem>>, vector<2x32xf32>
    %cst_37 = arith.constant dense<0.000000e+00> : vector<16x32xf32>
    %51 = tpu.matmul %49, %50, %cst_37 {dimension_numbers = #tpu.dot_dimension_numbers<[1], [0], [0], [1], [0, 0, 1, 1], [], []>} : vector<16x2xf32>, vector<2x32xf32>, vector<16x32xf32> -> vector<16x32xf32>
    %52 = arith.mulf %51, %19 : vector<16x32xf32>
    %53 = vector.shape_cast %52 : vector<16x32xf32> to vector<2x8x32xf32>
    %cst_38 = arith.constant dense<0.000000e+00> : vector<2x32xf32>
    %54 = vector.multi_reduction <add>, %53, %cst_38 [1] : vector<2x8x32xf32> to vector<2x32xf32>
    %c0_39 = arith.constant 0 : index
    %c0_40 = arith.constant 0 : index
    %55 = vector.load %arg14[%c0_39, %c0_40] : memref<32x32xf32, #tpu.memory_space<vmem>>, vector<32x32xf32>
    %cst_41 = arith.constant dense<0.000000e+00> : vector<2x32xf32>
    %56 = tpu.matmul %54, %55, %cst_41 {dimension_numbers = #tpu.dot_dimension_numbers<[1], [0], [0], [1], [0, 0, 1, 1], [], []>} : vector<2x32xf32>, vector<32x32xf32>, vector<2x32xf32> -> vector<2x32xf32>
    %c0_42 = arith.constant 0 : index
    %c0_43 = arith.constant 0 : index
    %57 = vector.load %arg15[%c0_42, %c0_43] : memref<1x32xf32, #tpu.memory_space<vmem>>, vector<1x32xf32>
    %58 = vector.broadcast %57 : vector<1x32xf32> to vector<2x32xf32>
    %59 = arith.addf %56, %58 : vector<2x32xf32>
    %cst_44 = arith.constant dense<0.000000e+00> : vector<2xf32>
    %60 = vector.multi_reduction <add>, %59, %cst_44 [1] : vector<2x32xf32> to vector<2xf32>
    %61 = vector.shape_cast %60 : vector<2xf32> to vector<2x1xf32>
    %cst_45 = arith.constant 3.200000e+01 : f32
    %62 = vector.broadcast %cst_45 : f32 to vector<2x1xf32>
    %63 = arith.divf %61, %62 : vector<2x1xf32>
    %64 = vector.broadcast %63 : vector<2x1xf32> to vector<2x32xf32>
    %65 = arith.subf %59, %64 : vector<2x32xf32>
    %66 = arith.mulf %65, %65 : vector<2x32xf32>
    %cst_46 = arith.constant dense<0.000000e+00> : vector<2xf32>
    %67 = vector.multi_reduction <add>, %66, %cst_46 [1] : vector<2x32xf32> to vector<2xf32>
    %68 = vector.shape_cast %67 : vector<2xf32> to vector<2x1xf32>
    %cst_47 = arith.constant 3.200000e+01 : f32
    %69 = vector.broadcast %cst_47 : f32 to vector<2x1xf32>
    %70 = arith.divf %68, %69 : vector<2x1xf32>
    %71 = vector.broadcast %63 : vector<2x1xf32> to vector<2x32xf32>
    %72 = arith.subf %59, %71 : vector<2x32xf32>
    %cst_48 = arith.constant 9.99999974E-6 : f32
    %73 = vector.broadcast %cst_48 : f32 to vector<2x1xf32>
    %74 = arith.addf %70, %73 : vector<2x1xf32>
    %75 = math.rsqrt %74 : vector<2x1xf32>
    %76 = vector.broadcast %75 : vector<2x1xf32> to vector<2x32xf32>
    %77 = arith.mulf %72, %76 : vector<2x32xf32>
    %c0_49 = arith.constant 0 : index
    %c0_50 = arith.constant 0 : index
    %78 = vector.load %arg16[%c0_49, %c0_50] : memref<1x32xf32, #tpu.memory_space<vmem>>, vector<1x32xf32>
    %79 = vector.broadcast %78 : vector<1x32xf32> to vector<2x32xf32>
    %80 = arith.mulf %77, %79 : vector<2x32xf32>
    %c0_51 = arith.constant 0 : index
    %c0_52 = arith.constant 0 : index
    %81 = vector.load %arg17[%c0_51, %c0_52] : memref<1x32xf32, #tpu.memory_space<vmem>>, vector<1x32xf32>
    %82 = vector.broadcast %81 : vector<1x32xf32> to vector<2x32xf32>
    %83 = arith.addf %80, %82 : vector<2x32xf32>
    %c0_53 = arith.constant 0 : index
    %c0_54 = arith.constant 0 : index
    %84 = vector.load %arg18[%c0_53, %c0_54] : memref<2x32xf32, #tpu.memory_space<vmem>>, vector<2x32xf32>
    tpu.vector_store %arg18[%c0_53, %c0_54], %83 {strides = array<i32>} : memref<2x32xf32, #tpu.memory_space<vmem>>, vector<2x32xf32>,
    return
  }
  func.func @transform_0(%arg0: i32) -> (i32, i32) {
    %c0_i32 = arith.constant 0 : i32
    %c0_i32_0 = arith.constant 0 : i32
    return %arg0, %c0_i32 : i32, i32
  }
  func.func @transform_1(%arg0: i32) -> (i32, i32) {
    %c0_i32 = arith.constant 0 : i32
    %c0_i32_0 = arith.constant 0 : i32
    return %arg0, %c0_i32 : i32, i32
  }
  func.func @transform_2(%arg0: i32) -> (i32, i32) {
    %c0_i32 = arith.constant 0 : i32
    %c0_i32_0 = arith.constant 0 : i32
    return %arg0, %c0_i32 : i32, i32
  }
  func.func @transform_3(%arg0: i32) -> (i32, i32) {
    %c0_i32 = arith.constant 0 : i32
    %c0_i32_0 = arith.constant 0 : i32
    return %arg0, %c0_i32 : i32, i32
  }
  func.func @transform_4(%arg0: i32) -> (i32, i32) {
    %c0_i32 = arith.constant 0 : i32
    %c0_i32_0 = arith.constant 0 : i32
    return %arg0, %c0_i32 : i32, i32
  }
  func.func @transform_5(%arg0: i32) -> (i32, i32) {
    %c0_i32 = arith.constant 0 : i32
    %c0_i32_0 = arith.constant 0 : i32
    return %arg0, %c0_i32 : i32, i32
  }
  func.func @transform_6(%arg0: i32) -> (i32, i32) {
    %c0_i32 = arith.constant 0 : i32
    %c0_i32_0 = arith.constant 0 : i32
    %c0_i32_1 = arith.constant 0 : i32
    return %c0_i32, %c0_i32_0 : i32, i32
  }
  func.func @transform_7(%arg0: i32) -> (i32, i32) {
    %c0_i32 = arith.constant 0 : i32
    %c0_i32_0 = arith.constant 0 : i32
    %c0_i32_1 = arith.constant 0 : i32
    return %c0_i32, %c0_i32_0 : i32, i32
  }
  func.func @transform_8(%arg0: i32) -> (i32, i32) {
    %c0_i32 = arith.constant 0 : i32
    %c0_i32_0 = arith.constant 0 : i32
    %c0_i32_1 = arith.constant 0 : i32
    return %c0_i32, %c0_i32_0 : i32, i32
  }
  func.func @transform_9(%arg0: i32) -> (i32, i32) {
    %c0_i32 = arith.constant 0 : i32
    %c0_i32_0 = arith.constant 0 : i32
    %c0_i32_1 = arith.constant 0 : i32
    return %c0_i32, %c0_i32_0 : i32, i32
  }
  func.func @transform_10(%arg0: i32) -> (i32, i32) {
    %c0_i32 = arith.constant 0 : i32
    %c0_i32_0 = arith.constant 0 : i32
    %c0_i32_1 = arith.constant 0 : i32
    return %c0_i32, %c0_i32_0 : i32, i32
  }
  func.func @transform_11(%arg0: i32) -> (i32, i32) {
    %c0_i32 = arith.constant 0 : i32
    %c0_i32_0 = arith.constant 0 : i32
    %c0_i32_1 = arith.constant 0 : i32
    return %c0_i32, %c0_i32_0 : i32, i32
  }
  func.func @transform_12(%arg0: i32) -> (i32, i32) {
    %c0_i32 = arith.constant 0 : i32
    %c0_i32_0 = arith.constant 0 : i32
    %c0_i32_1 = arith.constant 0 : i32
    return %c0_i32, %c0_i32_0 : i32, i32
  }
  func.func @transform_13(%arg0: i32) -> (i32, i32) {
    %c0_i32 = arith.constant 0 : i32
    %c0_i32_0 = arith.constant 0 : i32
    %c0_i32_1 = arith.constant 0 : i32
    return %c0_i32, %c0_i32_0 : i32, i32
  }
  func.func @transform_14(%arg0: i32) -> (i32, i32) {
    %c0_i32 = arith.constant 0 : i32
    %c0_i32_0 = arith.constant 0 : i32
    %c0_i32_1 = arith.constant 0 : i32
    return %c0_i32, %c0_i32_0 : i32, i32
  }
  func.func @transform_15(%arg0: i32) -> (i32, i32) {
    %c0_i32 = arith.constant 0 : i32
    %c0_i32_0 = arith.constant 0 : i32
    %c0_i32_1 = arith.constant 0 : i32
    return %c0_i32, %c0_i32_0 : i32, i32
  }
  func.func @transform_16(%arg0: i32) -> (i32, i32) {
    %c0_i32 = arith.constant 0 : i32
    %c0_i32_0 = arith.constant 0 : i32
    %c0_i32_1 = arith.constant 0 : i32
    return %c0_i32, %c0_i32_0 : i32, i32
  }
  func.func @transform_17(%arg0: i32) -> (i32, i32) {
    %c0_i32 = arith.constant 0 : i32
    %c0_i32_0 = arith.constant 0 : i32
    return %arg0, %c0_i32 : i32, i32
  }
  func.func @transform_18(%arg0: i32) -> (i32, i32) {
    %c0_i32 = arith.constant 0 : i32
    %c0_i32_0 = arith.constant 0 : i32
    return %arg0, %c0_i32 : i32, i32
  }
}

</mosaic_0001>

<bundles_post_ra>
// kernel: tpu_custom_call.1
= control target key start
LH: loop header
LB: loop body
LE: loop exit
PB: predicated region body
PF: predicated region fallthrough
CT: control target
= control target key end

     0   :  { %s1535_s0 = inlined_call_operand.vmem [shape: f32[2,16], index: 0, kind: input, shape index: {}]   ;;  %s1536_s1 = inlined_call_operand.vmem [shape: f32[2,8], index: 1, kind: input, shape index: {}]   ;;  %s1537_s2 = inlined_call_operand.vmem [shape: f32[16,16], index: 2, kind: input, shape index: {}]   ;;  %s1538_s3 = inlined_call_operand.vmem [shape: f32[16,8], index: 3, kind: input, shape index: {}]   ;;  %s1539_s4 = inlined_call_operand.vmem [shape: f32[16,8], index: 4, kind: input, shape index: {}]   ;;  %s1540_s5 = inlined_call_operand.hbm [shape: f32[2,8], index: 5, kind: input, shape index: {}]   ;;  %s1541_s6 = inlined_call_operand.vmem [shape: f32[16,32], index: 6, kind: input, shape index: {}]   ;;  %s1542_s7 = inlined_call_operand.vmem [shape: f32[8,32], index: 7, kind: input, shape index: {}]   ;;  %s1543_s8 = inlined_call_operand.vmem [shape: f32[16,64], index: 8, kind: input, shape index: {}]   ;;  %s1544_s9 = inlined_call_operand.vmem [shape: f32[8,64], index: 9, kind: input, shape index: {}]   ;;  %s1545_s10 = inlined_call_operand.vmem [shape: f32[8,64], index: 10, kind: input, shape index: {}]   ;;  %s1546_s11 = inlined_call_operand.vmem [shape: f32[32,2], index: 11, kind: input, shape index: {}]   ;;  %s1547_s12 = inlined_call_operand.vmem [shape: f32[2,32], index: 12, kind: input, shape index: {}]   ;;  %s1548_s13 = inlined_call_operand.vmem [shape: f32[32,32], index: 13, kind: input, shape index: {}]   ;;  %s1549_s14 = inlined_call_operand.vmem [shape: f32[1,32], index: 14, kind: input, shape index: {}]   ;;  %s1550_s15 = inlined_call_operand.vmem [shape: f32[1,32], index: 15, kind: input, shape index: {}]   ;;  %s1551_s16 = inlined_call_operand.vmem [shape: f32[1,32], index: 16, kind: input, shape index: {}]   ;;  %s1552_s17 = inlined_call_operand.hbm [shape: f32[2,32], index: 17, kind: output, shape index: {0}]   ;;  %s1553_s18 = inlined_call_operand.hbm [shape: f32[2,16], index: 18, kind: output, shape index: {1}]  }
   0x1   :  { %1555 = sst [smem:[#allocation11_spill]] %s1535_s0 }
   0x2   :  { %1556 = sst [smem:[#allocation12_spill]] %s1536_s1 }
   0x3   :  { %1557 = sst [smem:[#allocation13_spill]] %s1537_s2 }
   0x4   :  { %24 = vsyncpa [#allocation3], 0 }
   0x5   :  { %25 = vsyncpa [#allocation4], 0 }
   0x6   :  { %26 = vsyncpa [#allocation7], 0  ;;  %s1258_s27 = smov [#allocation2]   ;;  %s1186_s0 = scalar_lea.hbm %s1540_s5, 32 }
   0x7   :  { %s43_s28 = sshll.u32 %s1258_s27, 4  ;;  %p1187_p0 = scmp.ne.s32.totalorder %s1540_s5, %s1186_s0  ;;  %s44_s28 = int_to_ptr.vmem [resolvable:$true] %s43_s28 }
   0x8   :  { %p1190_p1 = scmp.lt.u32.totalorder %s1186_s0, %s1540_s5 }
   0xa   :  { %p1192_p2 = pnand %p1190_p1, %p1187_p0 }
   0xc   :  { %1195 = shalt.err (!%p1192_p2)
}
   0xd   :  { %s1196_s22 = scalar_lea.vmem %s44_s28, 32  ;;  %p1201_p4 = scmp.lt.s32.totalorder %s44_s28, %s44_s28 }
   0xe   :  { %p1197_p3 = scmp.ne.s32.totalorder %s44_s28, %s1196_s22  ;;  %p1202_p5 = scmp.lt.s32.totalorder %s1196_s22, %s1196_s22 }
  0x10   :  { %p1203_p6 = por %p1202_p5, %p1201_p4 }
  0x12   :  { %p1204_p7 = pnand %p1203_p6, %p1197_p3 }
  0x14   :  { %1207 = shalt.err (!%p1204_p7)
}
  0x15   :  { %46 = dma.hbm_to_vmem [thread:$0]  %s1540_s5, 32, %s44_s28, [#allocation3]  }
  0x16   :  { %1252 = dma.done.wait [#allocation3], 32  }
  0x17   :  { %1253 = vsyncadd [#allocation3], 4294967264  ;;  %v1259_v0 = vmov 0.0   ;;  %vm1260_vm0 = vmmov 0   ;;  %v1261_v1 = vmov 0.0|0.0   ;;  %vm77_vm1 = vcmask 64512  }
  0x18   :  { %1077 = vmatprep.subr.mxu1 %v1259_v0  ;;  %1079 = vmatprep.mubr.msk.f32.mxu1 %vm1260_vm0, %v1259_v0  ;;  %v76_v2 = vld [vmem:[%s1542_s7] sm:$0xff]  ;;  %s1558_s27 = sld [smem:[#allocation12_spill]]  ;;  %v74_v6 = vld [vmem:[%s1541_s6 + $0x8] sm:$0xff]  ;;  %s1559_s5 = sld [smem:[#allocation11_spill]]  ;;  %vm151_vm2 = vcmask 130048   ;;  %v484_v22 = vlaneseq  ;;  %v517_v23 = vld [vmem:[%s1546_s11 + $0x10] sm:$0xff] }
  0x19   :  { %1133 = vmatprep.subr.bf16.mxu0 %v1261_v1  ;;  %1086 = vmatprep.mubr.msk.f32.mxu0 %vm1260_vm0, %v1259_v0  ;;  %v231_v4 = vld [vmem:[%s1544_s9] sm:$0xff]  ;;  %v230_v10 = vld [vmem:[%s1538_s3 + $0x8] sm:$0xff]  ;;  %s1560_s28 = sld [smem:[#allocation13_spill]]  ;;  %v518_v24 = vld [vmem:[%s1546_s11 + $0x18] sm:$0xff]  ;;  %v1262_v32 = vmov 1966171168  }
  0x1a   :  { %1078 = vmatpush3.msra.mxu1 %v76_v2  ;;  %v73_v5 = vld [vmem:[%s1541_s6] sm:$0xff]  ;;  %v228_v11 = vld [vmem:[%s1543_s8 + $0x8] sm:$0xff]  ;;  %v1144_v25 = vpack.c.bf16 %v518_v24, %v517_v23  ;;  %v1450_v26 = vshrl.u32 %v484_v22, 7  ;;  %v482_v33 = vunpack.c.l.s4 %v1262_v32  ;;  %vm519_vm3 = vcmask 261120   ;;  %s1267_s25 = smov 8   ;;  %s1268_s19 = smov 2  }
  0x1b   :  { %v229_v7 = vld [vmem:[%s1538_s3] sm:$0xff]  ;;  %1089 = vmatprep.subr.mxu1 %v231_v4  ;;  %v1134_v8 = vpack.c.bf16 %v74_v6, %v73_v5  ;;  %v395_v18 = vld [vmem:[%s1539_s4 + $0x8] sm:$0xff]  ;;  %vm780_vm4 = vcmask 1041408   ;;  %vm626_vm6 = vcmask 15360   ;;  %vm896_vm8 = vcmask 1041409   ;;  %s1270_s1 = smov 10  }
  0x1c   :  { %v227_v9 = vld [vmem:[%s1543_s8] sm:$0xff]  ;;  %v516_v20 = vld [vmem:[%s1546_s11 + $0x8] sm:$0xff]  ;;  %v505_v27 = vsub.s32 0, %v1450_v26  ;;  %v613_v29 = vsub.s32 1, %v1450_v26  ;;  %v483_v35 = vunpack.c.0.s8 %v482_v33  ;;  %v1264_v33 = vmov 1983009808  }
  0x1d   :  { %1135 = vmatpush3.bf16.msra.mxu0 %v1134_v8  ;;  %v1136_v13 = vpack.c.bf16 %v228_v11, %v227_v9  ;;  %v396_v15 = vld [vmem:[%s1545_s10] sm:$0xff]  ;;  %vm970_vm9 = vcmask 254976   ;;  %s1269_s10 = smov 6   ;;  %s1272_s20 = smov 12   ;;  %vm760_vm10 = vcmask 31744   ;;  %vm762_vm11 = vcmask 48128  }
  0x1e   :  { %v75_v3 = vld [vmem:[%s1558_s27] sm:$0x3]  ;;  %v486_v37 = vsub.s32 %v483_v35, %v1450_v26  ;;  %vm765_vm12 = vcmask 80896   ;;  %vm767_vm13 = vcmask 97280   ;;  %s1273_s21 = smov [#allocation6]   ;;  %vm769_vm14 = vcmask 113664  }
  0x1f   :  { %1080 = vmatmul.mubr.msk.f32.vlgmr.msra.gmra.mrb[0].mxu1 %vm77_vm1, %v75_v3  ;;  %v72_v12 = vld [vmem:[%s1559_s5] sm:$0x3]  ;;  %v226_v16 = vld [vmem:[%s1560_s28 + $0x8] sm:$0xff]  ;;  %s1018_s7 = sshll.u32 %s1273_s21, 4  ;;  %vm771_vm15 = vcmask 123904   ;;  %s1019_s7 = int_to_ptr.vmem [resolvable:$true] %s1018_s7 }
  0x20   :  { %1090 = vmatpush3.msra.mxu1 %v231_v4  ;;  %1091 = vmatprep.mubr.msk.f32.mxu1 %vm77_vm1, %v229_v7  ;;  %v225_v14 = vld [vmem:[%s1560_s28] sm:$0xff]  ;;  %s1208_s22 = scalar_lea.vmem %s1019_s7, 32  ;;  %p1213_p9 = scmp.lt.s32.totalorder %s1019_s7, %s1019_s7 }
  0x21   :  { %1137 = vmatprep.subr.bf16.mxu1 %v1136_v13  ;;  %1087 = vmatmul.mubr.msk.f32.vlgmr.msra.gmra.mrb[0].mxu0 %vm151_vm2, %v72_v12  ;;  %v394_v17 = vld [vmem:[%s1539_s4] sm:$0xff]  ;;  %p1209_p8 = scmp.ne.s32.totalorder %s1019_s7, %s1208_s22  ;;  %p1214_p10 = scmp.lt.s32.totalorder %s1208_s22, %s1208_s22 }
  0x22   :  { %v515_v19 = vld [vmem:[%s1546_s11] sm:$0xff]  ;;  %s1263_s11 = smov 96  }
  0x23   :  { %1092 = vmatmul.mubr.msk.f32.vlgmr.msra.gmra.mrb[2].mxu1 %vm77_vm1, %v230_v10  ;;  %v1140_v21 = vpack.c.bf16 %v516_v20, %v515_v19  ;;  %v603_v28 = vld [vmem:[#allocation2] sm:$0x3]  ;;  %p1215_p11 = por %p1214_p10, %p1213_p9 }
  0x24   :  { %1139 = vmatpush3.bf16.msra.mxu1 %v1136_v13  ;;  %1098 = vmatprep.mubr.msk.f32.mxu1 %vm151_vm2, %v225_v14  ;;  %v607_v30 = vrot.slane %v603_v28, %v505_v27  ;;  %v614_v31 = vrot.slane %v603_v28, %v613_v29  ;;  %v773_v51 = vld [vmem:[%s1547_s12] sm:$0x3]  ;;  %s1266_s12 = smov 4  }
  0x25   :  { %1101 = vmatprep.subr.mxu1 %v396_v15  ;;  %1141 = vmatprep.subr.bf16.mxu0 %v1140_v21  ;;  %p1216_p12 = pnand %p1215_p11, %p1209_p8 }
  0x26   :  { %1143 = vmatpush3.bf16.msra.mxu0 %v1140_v21  ;;  %609 = vbcast.lane.b32.xlu0 %v607_v30, 256 }
  0x27   :  { %1145 = vmatprep.subr.bf16.mxu0 %v1144_v25 }
  0x2a   :  { %1147 = vmatpush3.bf16.msra.mxu0 %v1144_v25  ;;  %616 = vbcast.lane.b32.xlu0 %v614_v31, 256 }
  0x2b   :  { %1099 = vmatmul.mubr.msk.f32.vlgmr.msra.gmra.mrb[2].mxu1 %vm151_vm2, %v226_v16  ;;  %1148 = vmatprep.subr.bf16.mxu0 %v1261_v1 }
  0x2c   :  { %1102 = vmatpush3.msra.mxu1 %v396_v15  ;;  %1103 = vmatprep.mubr.msk.f32.mxu1 %vm77_vm1, %v394_v17 }
  0x2d   :  { %1117 = vmatprep.subr.msk.mxu1 %vm780_vm4, %v773_v51 }
  0x33   :  { %1104 = vmatmul.mubr.msk.f32.vlgmr.msra.gmra.mrb[2].mxu1 %vm77_vm1, %v395_v18 }
  0x34   :  { %1118 = vmatpush3.msk.msra.mxu1 %vm780_vm4, %v773_v51 }
  0x98   :  { %v610_v52 = vpop.permute.xlu0 %609 }
  0x99   :  { %vm618_vm7 = vcmp.gt.f32.partialorder %v610_v52, 0.0 }
  0x9c   :  { %v617_v53 = vpop.permute.xlu0 %616 }
  0x9d   :  { %vm619_vm5 = vcmp.gt.f32.partialorder %v617_v53, 0.0 }
  0xf2   :  { %v147_v34 = vpop.f32.mrb[0].mxu1 }
  0xf3   :  { %v1081_v36 = vpop.f32.mrb[1].mxu1 }
  0xf4   :  { %v221_v38 = vpop.f32.mrb[0].mxu0  ;;  %v1265_v36 = vmov 1934713408  }
  0xf5   :  { %v222_v39 = vadd.f32 %v221_v38, %v147_v34  ;;  %v1088_v40 = vpop.f32.mrb[1].mxu0  ;;  %v667_v34 = vunpack.c.l.s4 %v1264_v33 }
  0xf7   :  { %v487_v41 = vrot.slane %v222_v39, %v486_v37  ;;  %v668_v35 = vunpack.c.0.s8 %v667_v34 }
  0xf9   :  { %v488_v42 = vcombine.high %v487_v41, %v487_v41  ;;  %v495_v44 = vrot.slane %v487_v41, %v486_v37  ;;  %v671_v38 = vsub.s32 %v668_v35, %v1450_v26 }
  0xfb   :  { %v502_v43 = vrot.slane %v488_v42, %v486_v37  ;;  %v506_v47 = vrot.slane %v495_v44, %v505_v27  ;;  %v698_v37 = vunpack.c.l.s4 %v1265_v36 }
  0xfd   :  { %v510_v45 = vrot.slane %v502_v43, %v505_v27  ;;  %v699_v40 = vunpack.c.0.s8 %v698_v37 }
 0x106   :  { %v1105_v46 = vpop.f32.mrb[2].mxu1 }
 0x107   :  { %v514_v48 = vmul.f32 %v1105_v46, %v510_v45  ;;  %v469_v49 = vpop.f32.mrb[3].mxu1 }
 0x108   :  { %v513_v50 = vmul.f32 %v506_v47, %v469_v49  ;;  %861 = vrot.lane.b32.xlu1 %v469_v49, %s1263_s11  ;;  %v702_v47 = vsub.s32 %v699_v40, %v1450_v26  ;;  %v883_v26 = vld [vmem:[%s1548_s13] sm:$0xff] }
 0x10a   :  { %1114 = vmatprep.mubr.msk.f32.mxu0 %vm519_vm3, %v513_v50 }
 0x10b   :  { %1115 = vmatmul.mubr.msk.f32.vlgmr.msra.gmra.mrb[2].mxu0 %vm519_vm3, %v514_v48 }
 0x10c   :  { %863 = vrot.lane.b32.xlu1 %v1105_v46, %s1263_s11  ;;  %1130 = vmatprep.mubr.msk.f32.mxu0 %vm1260_vm0, %v1259_v0 }
 0x1de   :  { %v1116_v54 = vpop.f32.mrb[2].mxu0 }
 0x1df   :  { %v602_v55 = vmul.f32 0.25, %v1116_v54  ;;  %v592_v56 = vpop.f32.mrb[3].mxu0 }
 0x1e0   :  { %v601_v57 = vmul.f32 0.25, %v592_v56 }
 0x1e1   :  { %v625_v58 = vsel %vm619_vm5, -1e+10, %v602_v55 }
 0x1e2   :  { %v634_v59 = vsel %vm626_vm6, %v625_v58, -inf  ;;  %v624_v60 = vsel %vm618_vm7, -1e+10, %v601_v57 }
 0x1e3   :  { %v635_v61 = vrot.slane %v634_v59, 4  ;;  %v627_v62 = vsel %vm626_vm6, %v624_v60, -inf }
 0x1e4   :  { %v628_v63 = vrot.slane %v627_v62, 4 }
 0x1e5   :  { %v636_v2 = vmax.f32 %v634_v59, %v635_v61  ;;  %v884_v59 = vld [vmem:[%s1548_s13 + $0x8] sm:$0xff]  ;;  %v885_v61 = vld [vmem:[%s1548_s13 + $0x10] sm:$0xff] }
 0x1e6   :  { %v629_v3 = vmax.f32 %v627_v62, %v628_v63  ;;  %v886_v62 = vld [vmem:[%s1548_s13 + $0x18] sm:$0xff] }
 0x1e7   :  { %v637_v4 = vrot.slane %v636_v2, 2  ;;  %v1152_v63 = vpack.c.bf16 %v886_v62, %v885_v61 }
 0x1e8   :  { %v630_v5 = vrot.slane %v629_v3, 2 }
 0x1e9   :  { %v638_v6 = vmax.f32 %v636_v2, %v637_v4  ;;  %v862_v2 = vpop.permute.xlu1 %861 }
 0x1ea   :  { %v631_v7 = vmax.f32 %v629_v3, %v630_v5 }
 0x1eb   :  { %v639_v8 = vrot.slane %v638_v6, 1 }
 0x1ec   :  { %v632_v9 = vrot.slane %v631_v7, 1 }
 0x1ed   :  { %v640_v10 = vmax.f32 %v638_v6, %v639_v8  ;;  %v864_v3 = vpop.permute.xlu1 %863 }
 0x1ee   :  { %v633_v11 = vmax.f32 %v631_v7, %v632_v9 }
 0x1ef   :  { %v642_v12 = vsub.f32 %v625_v58, %v640_v10 }
 0x1f0   :  { %v641_v13 = vsub.f32 %v624_v60, %v633_v11  ;;  %v1149_v60 = vpack.c.bf16 %v884_v59, %v883_v26 }
 0x1f1   :  { %v645_v14 = vmul.f32 1.442695, %v642_v12 }
 0x1f2   :  { %v643_v15 = vmul.f32 1.442695, %v641_v13  ;;  %1150 = vmatpush3.bf16.msra.mxu0 %v1149_v60 }
 0x1f3   :  { %1176 = vpow2.f32 %v645_v14  ;;  %1151 = vmatprep.subr.bf16.mxu0 %v1261_v1 }
 0x1f4   :  { %1178 = vpow2.f32 %v643_v15 }
 0x1f6   :  { %1153 = vmatpush3.bf16.msra.mxu0 %v1152_v63 }
 0x1fd   :  { %v1177_v16 = vpop.eup %1176 }
 0x1fe   :  { %v1179_v17 = vpop.eup %1178  ;;  %v654_v18 = vsel %vm626_vm6, %v1177_v16, 0.0 }
 0x1ff   :  { %v655_v19 = vrot.slane %v654_v18, 4  ;;  %v647_v20 = vsel %vm626_vm6, %v1179_v17, 0.0 }
 0x200   :  { %v648_v21 = vrot.slane %v647_v20, 4 }
 0x201   :  { %v656_v22 = vadd.f32 %v655_v19, %v654_v18 }
 0x202   :  { %v649_v23 = vadd.f32 %v648_v21, %v647_v20 }
 0x203   :  { %v657_v24 = vrot.slane %v656_v22, 2 }
 0x204   :  { %v650_v25 = vrot.slane %v649_v23, 2 }
 0x205   :  { %v658_v27 = vadd.f32 %v657_v24, %v656_v22  ;;  %v1044_v22 = vld [vmem:[%s1549_s14] ss:$0 sm:$0xff]  ;;  %s1271_s14 = smov 14  }
 0x206   :  { %v651_v28 = vadd.f32 %v650_v25, %v649_v23 }
 0x207   :  { %v659_v29 = vrot.slane %v658_v27, 1 }
 0x208   :  { %v652_v30 = vrot.slane %v651_v28, 1 }
 0x209   :  { %v660_v31 = vadd.f32 %v659_v29, %v658_v27 }
 0x20a   :  { %v653_v32 = vadd.f32 %v652_v30, %v651_v28 }
 0x20b   :  { %1180 = vrcp.f32 %v660_v31 }
 0x20c   :  { %1182 = vrcp.f32 %v653_v32 }
 0x215   :  { %v1181_v39 = vpop.eup %1180 }
 0x216   :  { %v1183_v41 = vpop.eup %1182  ;;  %v664_v42 = vmul.f32 %v1181_v39, %v1177_v16 }
 0x217   :  { %v662_v43 = vmul.f32 %v1183_v41, %v1179_v17 }
 0x218   :  { %v687_v44 = vrot.slane %v664_v42, %v671_v38  ;;  %v680_v45 = vcombine.high %v664_v42, %v1259_v0 }
 0x219   :  { %1119 = vmatprep.mubr.msk.f32.mxu1 %vm626_vm6, %v662_v43  ;;  %v672_v46 = vrot.slane %v662_v43, %v671_v38  ;;  %v665_v48 = vcombine.high %v662_v43, %v1259_v0 }
 0x21a   :  { %1120 = vmatmul.mubr.msk.f32.vlgmr.msra.gmra.mrb[4].mxu1 %vm626_vm6, %v664_v42  ;;  %v694_v49 = vrot.slane %v680_v45, %v671_v38 }
 0x21b   :  { %v696_v50 = vcombine.high %v672_v46, %v687_v44  ;;  %v679_v51 = vrot.slane %v665_v48, %v671_v38  ;;  %v695_v52 = vcombine.low %v672_v46, %v687_v44 }
 0x21d   :  { %v710_v53 = vrot.slane %v696_v50, %v702_v47  ;;  %v711_v54 = vcombine.low %v679_v51, %v694_v49  ;;  %v1473_v55 = vrot.slane %v695_v52, %v702_v47  ;;  %v712_v56 = vcombine.high %v679_v51, %v694_v49 }
 0x21f   :  { %736 = vrot.lane.b32.xlu1 %v710_v53, %s1266_s12  ;;  %v726_v57 = vrot.slane %v712_v56, %v702_v47  ;;  %v719_v58 = vrot.slane %v711_v54, %v702_v47  ;;  %v727_v28 = vcombine.high %v1473_v55, %v1259_v0  ;;  %v728_v29 = vcombine.high %v710_v53, %v1259_v0 }
 0x221   :  { %v729_v30 = vcombine.high %v719_v58, %v1259_v0  ;;  %v730_v31 = vcombine.high %v726_v57, %v1259_v0 }
 0x223   :  { %744 = vrot.lane.b32.xlu1 %v719_v58, %s1267_s25 }
 0x291   :  { %v737_v38 = vpop.permute.xlu1 %736 }
 0x295   :  { %v745_v40 = vpop.permute.xlu1 %744 }
 0x2ed   :  { %v1121_v4 = vpop.f32.mrb[4].mxu1 }
 0x2ee   :  { %v868_v5 = vmul.f32 %v1121_v4, %v864_v3  ;;  %v850_v6 = vpop.f32.mrb[5].mxu1 }
 0x2ef   :  { %v867_v7 = vmul.f32 %v862_v2, %v850_v6 }
 0x2f0   :  { %v876_v8 = vsel %vm519_vm3, %v868_v5, 0.0 }
 0x2f1   :  { %v877_v9 = vrot.slane %v876_v8, 4  ;;  %v869_v1 = vsel %vm519_vm3, %v867_v7, 0.0 }
 0x2f2   :  { %v870_v10 = vrot.slane %v869_v1, 4 }
 0x2f3   :  { %v878_v11 = vadd.f32 %v877_v9, %v876_v8 }
 0x2f4   :  { %v871_v12 = vadd.f32 %v870_v10, %v869_v1 }
 0x2f5   :  { %v879_v13 = vrot.slane %v878_v11, 2 }
 0x2f6   :  { %v872_v14 = vrot.slane %v871_v12, 2 }
 0x2f7   :  { %v880_v15 = vadd.f32 %v879_v13, %v878_v11 }
 0x2f8   :  { %v873_v16 = vadd.f32 %v872_v14, %v871_v12 }
 0x2f9   :  { %v881_v17 = vrot.slane %v880_v15, 1 }
 0x2fa   :  { %v874_v18 = vrot.slane %v873_v16, 1 }
 0x2fb   :  { %v882_v19 = vadd.f32 %v881_v17, %v880_v15 }
 0x2fc   :  { %v875_v20 = vadd.f32 %v874_v18, %v873_v16 }
 0x2fe   :  { %v897_v21 = vsel %vm896_vm8, %v882_v19, %v875_v20 }
 0x2ff   :  { %1131 = vmatmul.mubr.msk.f32.vlgmr.msra.gmra.mrb[4].mxu0 %vm519_vm3, %v897_v21 }
 0x3d2   :  { %v966_v23 = vpop.f32.mrb[4].mxu0 }
 0x3d3   :  { %v967_v24 = vadd.f32 %v1044_v22, %v966_v23  ;;  %v1132_v25 = vpop.f32.mrb[5].mxu0 }
 0x3d5   :  { %v971_v27 = vsel %vm970_vm9, %v967_v24, 0.0 }
 0x3d6   :  { %972 = vadd.xlane.f32.xlu0 %v971_v27 }
 0x3ec   :  { %732 = vrot.lane.b32.xlu0 %v727_v28, %s1268_s19 }
 0x3f0   :  { %740 = vrot.lane.b32.xlu0 %v728_v29, %s1269_s10 }
 0x3f4   :  { %748 = vrot.lane.b32.xlu0 %v729_v30, %s1270_s1 }
 0x3f8   :  { %756 = vrot.lane.b32.xlu0 %v730_v31, %s1271_s14 }
 0x463   :  { %v973_v32 = vpop.xlane.xlu0 %972 }
 0x464   :  { %v975_v33 = vmul.f32 0.03125, %v973_v32 }
 0x466   :  { %v976_v34 = vsub.f32 %v967_v24, %v975_v33 }
 0x467   :  { %v733_v37 = vpop.permute.xlu0 %732 }
 0x468   :  { %v977_v35 = vmul.f32 %v976_v34, %v976_v34  ;;  %v759_v41 = vsel %vm626_vm6, %v1473_v55, %v733_v37 }
 0x469   :  { %v761_v0 = vsel %vm760_vm10, %v759_v41, %v737_v38 }
 0x46a   :  { %v978_v36 = vsel %vm970_vm9, %v977_v35, 0.0 }
 0x46b   :  { %979 = vadd.xlane.f32.xlu1 %v978_v36  ;;  %v741_v39 = vpop.permute.xlu0 %740 }
 0x46c   :  { %v763_v43 = vsel %vm762_vm11, %v761_v0, %v741_v39 }
 0x46d   :  { %v764_v46 = vsel %vm77_vm1, %v763_v43, %v745_v40 }
 0x46f   :  { %v749_v42 = vpop.permute.xlu0 %748 }
 0x470   :  { %v766_v48 = vsel %vm765_vm12, %v764_v46, %v749_v42 }
 0x473   :  { %v757_v50 = vpop.permute.xlu0 %756 }
 0x47c   :  { %752 = vrot.lane.b32.xlu1 %v726_v57, %s1272_s20 }
 0x4f8   :  { %v980_v44 = vpop.xlane.xlu1 %979 }
 0x4f9   :  { %v981_v45 = vmul.f32 0.03125, %v980_v44 }
 0x4fb   :  { %v982_v47 = vadd.f32 1e-05, %v981_v45 }
 0x4fc   :  { %v753_v49 = vpop.permute.xlu1 %752 }
 0x4fd   :  { %1184 = vrsqrt.f32 %v982_v47  ;;  %v768_v51 = vsel %vm767_vm13, %v766_v48, %v753_v49 }
 0x4fe   :  { %v770_v52 = vsel %vm769_vm14, %v768_v51, %v757_v50 }
 0x4ff   :  { %772 = vst.msk [vmem:[#allocation6] sm:$0x3] %vm771_vm15, %v770_v52 }
 0x500   :  { %1219 = shalt.err (!%p1216_p12)
}
 0x501   :  { %s1220_s6 = scalar_lea.hbm %s1553_s18, 32 }
 0x502   :  { %p1221_p13 = scmp.ne.s32.totalorder %s1553_s18, %s1220_s6  ;;  %p1224_p0 = scmp.lt.u32.totalorder %s1220_s6, %s1553_s18 }
 0x504   :  { %p1226_p1 = pnand %p1224_p0, %p1221_p13 }
 0x506   :  { %1229 = shalt.err (!%p1226_p1)
}
 0x507   :  { %1021 = dma.vmem_to_hbm [thread:$0]  %s1019_s7, 32, %s1553_s18, [#allocation7]   ;;  %v1185_v53 = vpop.eup %1184  ;;  %v1046_v54 = vld [vmem:[%s1550_s15] ss:$0 sm:$0xff] }
 0x508   :  { %v984_v55 = vmul.f32 %v1185_v53, %v976_v34  ;;  %v1047_v56 = vld [vmem:[%s1551_s16] ss:$0 sm:$0xff]  ;;  %s1274_s29 = smov [#allocation5]  }
 0x509   :  { %s1008_s30 = sshll.u32 %s1274_s29, 4  ;;  %s1009_s30 = int_to_ptr.vmem [resolvable:$true] %s1008_s30 }
 0x50a   :  { %v992_v57 = vmul.f32 %v1046_v54, %v984_v55  ;;  %s1230_s3 = scalar_lea.vmem %s1009_s30, 32  ;;  %p1235_p3 = scmp.lt.s32.totalorder %s1009_s30, %s1009_s30 }
 0x50b   :  { %p1231_p2 = scmp.ne.s32.totalorder %s1009_s30, %s1230_s3  ;;  %p1236_p4 = scmp.lt.s32.totalorder %s1230_s3, %s1230_s3 }
 0x50c   :  { %v1000_v58 = vadd.f32 %v1047_v56, %v992_v57 }
 0x50d   :  { %p1237_p5 = por %p1236_p4, %p1235_p3 }
 0x50e   :  { %1001 = vst.msk [vmem:[#allocation5] sm:$0x3] %vm970_vm9, %v1000_v58 }
 0x50f   :  { %p1238_p6 = pnand %p1237_p5, %p1231_p2 }
 0x511   :  { %1241 = shalt.err (!%p1238_p6)
}
 0x512   :  { %s1242_s8 = scalar_lea.hbm %s1552_s17, 32 }
 0x513   :  { %p1243_p7 = scmp.ne.s32.totalorder %s1552_s17, %s1242_s8  ;;  %p1246_p8 = scmp.lt.u32.totalorder %s1242_s8, %s1552_s17 }
 0x515   :  { %p1248_p9 = pnand %p1246_p8, %p1243_p7 }
 0x517   :  { %1251 = shalt.err (!%p1248_p9)
}
 0x518   :  { %1011 = dma.vmem_to_hbm [thread:$0]  %s1009_s30, 32, %s1552_s17, [#allocation4]  }
 0x519   :  { %1254 = dma.done.wait [#allocation4], 32  }
 0x51a   :  { %1255 = vsyncadd [#allocation4], 4294967264 }
 0x51b   :  { %1256 = dma.done.wait [#allocation7], 32  }
 0x51c   :  { %1257 = vsyncadd [#allocation7], 4294967264 }
 0x51d   :  { %1028 = vsyncpa [#allocation3], 1 }
 0x51e   :  { %1029 = vsyncpa [#allocation4], 1 }
 0x51f   :  { %1030 = vsyncpa [#allocation7], 1 }

</bundles_post_ra>
